<compile_context>
chip_gen: v7x
topology: tpu7x:2x2x1
jax: 0.10.0
libtpu: 0.0.40
codegen_flags: <defaults>
</compile_context>

<pallas_src>
import jax
import jax.numpy as jnp
from jax.experimental import pallas as pl
from jax.experimental.pallas import tpu as pltpu

NEG_SLOPE = 0.01  # torch.nn.LeakyReLU default
LANE = 128


def _round_up(x, m):
    return (x + m - 1) // m * m


def _leaky_relu(x):
    return jnp.where(x > 0, x, NEG_SLOPE * x)


def mlp_kernel(x_ref, w1_ref, w2_ref, w3_ref, w4_ref, b_ref, o_ref):
    """Fused 4-layer MLP on one batch tile.

    x_ref : (TILE_B, IN_PAD) f32      w1 : (IN_PAD, HP) bf16
    w2,w3 : (HP, HP) bf16             w4 : (1, HP) f32 (row vector)
    b_ref : (4, HP) f32 packed biases o_ref: (TILE_B, 1) f32

    Padded-lane correctness relies on LeakyReLU(0) == 0 together with
    zero-padded weight rows/cols, zero-padded biases and a zero-padded w4.
    If the activation ever changes to one with f(0) != 0, mask the pad lanes.
    """
    # Cast activations to bf16 in-kernel (input stays f32 in HBM -> one read).
    x = x_ref[...].astype(jnp.bfloat16)

    # Layers 1..3: bf16 MXU matmul, f32 accumulation, f32 bias + LeakyReLU.
    h = jnp.dot(x, w1_ref[...], preferred_element_type=jnp.float32)
    h = _leaky_relu(h + b_ref[0:1, :])
    h = jnp.dot(h.astype(jnp.bfloat16), w2_ref[...],
                preferred_element_type=jnp.float32)
    h = _leaky_relu(h + b_ref[1:2, :])
    h = jnp.dot(h.astype(jnp.bfloat16), w3_ref[...],
                preferred_element_type=jnp.float32)
    h = _leaky_relu(h + b_ref[2:3, :])

    # Final (HP -> 1) layer: VPU multiply + XLU lane reduce instead of an
    # N=1 MXU matmul (padded lanes of h / w4 are zero, so they contribute 0).
    y = jnp.sum(h * w4_ref[...], axis=-1, keepdims=True) + b_ref[3:4, 0:1]
    o_ref[...] = y


def init_params(key, input_size, h1, h2, h3):
    """Raw f32 params mimicking nn.Linear U(-1/sqrt(fan_in), 1/sqrt(fan_in))."""
    dims = [(input_size, h1), (h1, h2), (h2, h3), (h3, 1)]
    params = {}
    for i, (fan_in, fan_out) in enumerate(dims, start=1):
        key, kw, kb = jax.random.split(key, 3)
        bound = 1.0 / (fan_in ** 0.5)
        params[f"w{i}"] = jax.random.uniform(
            kw, (fan_in, fan_out), jnp.float32, -bound, bound)
        params[f"b{i}"] = jax.random.uniform(
            kb, (fan_out,), jnp.float32, -bound, bound)
    return params


def pack_params(params, input_size):
    """Pad widths to full 128-lane tiles, cast matmul weights to bf16 and pack
    all four biases into a single (4, HP) f32 buffer (one DMA)."""
    h1 = params["w1"].shape[1]
    h2 = params["w2"].shape[1]
    h3 = params["w3"].shape[1]
    in_pad = _round_up(input_size, LANE)
    hp = max(_round_up(h1, LANE), _round_up(h2, LANE), _round_up(h3, LANE))

    def pad2(w, rows, cols):
        out = jnp.zeros((rows, cols), jnp.float32)
        return out.at[:w.shape[0], :w.shape[1]].set(w)

    w1 = pad2(params["w1"], in_pad, hp).astype(jnp.bfloat16)
    w2 = pad2(params["w2"], hp, hp).astype(jnp.bfloat16)
    w3 = pad2(params["w3"], hp, hp).astype(jnp.bfloat16)
    w4 = jnp.zeros((1, hp), jnp.float32).at[0, :h3].set(params["w4"][:, 0])

    bias = jnp.zeros((4, hp), jnp.float32)
    bias = bias.at[0, :h1].set(params["b1"])
    bias = bias.at[1, :h2].set(params["b2"])
    bias = bias.at[2, :h3].set(params["b3"])
    bias = bias.at[3, 0].set(params["b4"][0])

    return {"w1": w1, "w2": w2, "w3": w3, "w4": w4, "bias": bias,
            "in_features": input_size, "in_pad": in_pad, "hp": hp}


def _choose_batch_tiling(B, max_tile=2048):
    """Pick (tile_b, b_pad).

    * Small batches (< 2048 rows): one minimal tile, round_up(B, 8) rows —
      no 32x redundant work, minimal latency.
    * Large batches: ~max_tile-row tiles, always >= 2 grid steps so the
      "parallel" batch axis shards across both v7x TensorCores (no-op on
      v5e/v6e), with at most 8 * n_tiles rows of padding.
    """
    b8 = _round_up(max(B, 1), 8)
    if b8 < 2 * 1024:
        return b8, b8
    n_tiles = max(2, -(-b8 // max_tile))
    tile_b = _round_up(-(-b8 // n_tiles), 8)
    return tile_b, tile_b * n_tiles


def regression_hertz_forward(x, kp, max_tile_b=2048):
    """x: (B, H, W) float32.  kp: packed params from pack_params."""
    B = x.shape[0]
    x2d = x.reshape(B, -1).astype(jnp.float32)
    in_features, in_pad, hp = kp["in_features"], kp["in_pad"], kp["hp"]
    assert x2d.shape[1] == in_features

    tile_b, b_pad = _choose_batch_tiling(B, max_tile_b)

    # No wrapper-side bf16 copy: only pad (batch and/or feature dim) when the
    # shapes actually require it; in the common case x goes straight to the
    # kernel and is cast to bf16 on-chip.
    if b_pad != B or in_pad != in_features:
        xb = jnp.zeros((b_pad, in_pad), jnp.float32)
        xb = xb.at[:B, :in_features].set(x2d)
    else:
        xb = x2d

    grid = (b_pad // tile_b,)
    flops = 2 * b_pad * (in_pad * hp + hp * hp + hp * hp + hp)
    bytes_accessed = (xb.size * 4
                      + kp["w1"].size * 2 + kp["w2"].size * 2 + kp["w3"].size * 2
                      + kp["w4"].size * 4 + kp["bias"].size * 4
                      + b_pad * 4)

    out = pl.pallas_call(
        mlp_kernel,
        out_shape=jax.ShapeDtypeStruct((b_pad, 1), jnp.float32),
        grid=grid,
        in_specs=[
            # Activations: tiled over the batch grid (double-buffered DMA).
            pl.BlockSpec((tile_b, in_pad), lambda i: (i, 0)),
            # Weights / packed bias: constant index_map -> resident in VMEM.
            pl.BlockSpec((in_pad, hp), lambda i: (0, 0)),
            pl.BlockSpec((hp, hp), lambda i: (0, 0)),
            pl.BlockSpec((hp, hp), lambda i: (0, 0)),
            pl.BlockSpec((1, hp), lambda i: (0, 0)),
            pl.BlockSpec((4, hp), lambda i: (0, 0)),
        ],
        # Minimal-width output block: 4 B/row of HBM write (last dim == full
        # array dim, so the (8,128) constraint is satisfied).
        out_specs=pl.BlockSpec((tile_b, 1), lambda i: (i, 0)),
        compiler_params=pltpu.CompilerParams(
            dimension_semantics=("parallel",)),  # megacore sharding on v7x
        cost_estimate=pl.CostEstimate(
            flops=flops, transcendentals=0, bytes_accessed=bytes_accessed),
    )(xb, kp["w1"], kp["w2"], kp["w3"], kp["w4"], kp["bias"])

    return out[:B]


def _mirror_reference(x, kp):
    """Pure-JAX math identical to the kernel (bf16 MXU inputs, f32 accum)."""
    B = x.shape[0]
    x2d = x.reshape(B, -1).astype(jnp.float32)
    xb = jnp.zeros((B, kp["in_pad"]), jnp.float32)
    xb = xb.at[:, :kp["in_features"]].set(x2d)
    h = jnp.dot(xb.astype(jnp.bfloat16), kp["w1"],
                preferred_element_type=jnp.float32) + kp["bias"][0:1]
    h = _leaky_relu(h)
    h = jnp.dot(h.astype(jnp.bfloat16), kp["w2"],
                preferred_element_type=jnp.float32) + kp["bias"][1:2]
    h = _leaky_relu(h)
    h = jnp.dot(h.astype(jnp.bfloat16), kp["w3"],
                preferred_element_type=jnp.float32) + kp["bias"][2:3]
    h = _leaky_relu(h)
    return jnp.sum(h * kp["w4"], axis=-1, keepdims=True) + kp["bias"][3, 0]


def _f32_reference(x, params):
    """Full-precision reference matching the PyTorch module semantics."""
    h = x.reshape(x.shape[0], -1)
    h = _leaky_relu(h @ params["w1"] + params["b1"])
    h = _leaky_relu(h @ params["w2"] + params["b2"])
    h = _leaky_relu(h @ params["w3"] + params["b3"])
    return h @ params["w4"] + params["b4"]


if __name__ == "__main__":
    # Small shapes consistent with the module: input_shape=(16,16) -> 256 feats.
    B = 8
    INPUT_SHAPE = (16, 16)
    HIDDEN_UNITS_1, HIDDEN_UNITS_2, HIDDEN_UNITS_3 = 128, 64, 32
    INPUT_SIZE = INPUT_SHAPE[0] * INPUT_SHAPE[1]

    key = jax.random.PRNGKey(0)
    key, kx = jax.random.split(key)
    x = jax.random.normal(kx, (B,) + INPUT_SHAPE, dtype=jnp.float32)

    raw_params = init_params(key, INPUT_SIZE,
                             HIDDEN_UNITS_1, HIDDEN_UNITS_2, HIDDEN_UNITS_3)
    kparams = pack_params(raw_params, INPUT_SIZE)

    out = regression_hertz_forward(x, kparams)
    out = jax.block_until_ready(out)
    assert out.shape == (B, 1), out.shape

    # Tight check against a pure-JAX mirror of the kernel's bf16/f32 math.
    mirror = _mirror_reference(x, kparams)
    assert jnp.allclose(out, mirror, atol=1e-4, rtol=1e-4), "mismatch vs bf16 mirror"

    # Looser check against the full-f32 PyTorch-equivalent reference
    # (bf16 MXU inputs introduce ~0.1-1% error).
    ref = _f32_reference(x, raw_params)
    assert jnp.allclose(out, ref, atol=5e-2, rtol=5e-2), "mismatch vs f32 reference"

    print("KERNEL_OK")
</pallas_src>

<mosaic_0001>
module attributes {stable_mosaic.version = 11 : i64} {
  func.func @mlp_kernel(%arg0: i32, %arg1: memref<8x256xf32, #tpu.memory_space<vmem>>, %arg2: memref<256x128xbf16, #tpu.memory_space<vmem>>, %arg3: memref<128x128xbf16, #tpu.memory_space<vmem>>, %arg4: memref<128x128xbf16, #tpu.memory_space<vmem>>, %arg5: memref<1x128xf32, #tpu.memory_space<vmem>>, %arg6: memref<4x128xf32, #tpu.memory_space<vmem>>, %arg7: memref<8x1xf32, #tpu.memory_space<vmem>>) attributes {dimension_semantics = [#tpu.dimension_semantics<parallel>], iteration_bounds = array<i64: 1>, scalar_prefetch = 0 : i64, scratch_operands = 0 : i64, tpu.core_type = #tpu.core_type<tc>, window_params = [{transform_indices = @transform_0, window_bounds = array<i64: 8, 256>}, {pipeline_mode = #tpu.pipeline_mode<synchronous>, transform_indices = @transform_1, window_bounds = array<i64: 256, 128>}, {pipeline_mode = #tpu.pipeline_mode<synchronous>, transform_indices = @transform_2, window_bounds = array<i64: 128, 128>}, {pipeline_mode = #tpu.pipeline_mode<synchronous>, transform_indices = @transform_3, window_bounds = array<i64: 128, 128>}, {pipeline_mode = #tpu.pipeline_mode<synchronous>, transform_indices = @transform_4, window_bounds = array<i64: 1, 128>}, {pipeline_mode = #tpu.pipeline_mode<synchronous>, transform_indices = @transform_5, window_bounds = array<i64: 4, 128>}, {transform_indices = @transform_6, window_bounds = array<i64: 8, 1>}]} {
    %c0 = arith.constant 0 : index
    %c0_0 = arith.constant 0 : index
    %0 = vector.load %arg1[%c0, %c0_0] : memref<8x256xf32, #tpu.memory_space<vmem>>, vector<8x256xf32>
    %1 = arith.truncf %0 : vector<8x256xf32> to vector<8x256xbf16>
    %c0_1 = arith.constant 0 : index
    %c0_2 = arith.constant 0 : index
    %2 = vector.load %arg2[%c0_1, %c0_2] : memref<256x128xbf16, #tpu.memory_space<vmem>>, vector<256x128xbf16>
    %cst = arith.constant dense<0.000000e+00> : vector<8x128xf32>
    %3 = tpu.matmul %1, %2, %cst {dimension_numbers = #tpu.dot_dimension_numbers<[1], [0], [0], [1], [0, 0, 1, 1], [], []>} : vector<8x256xbf16>, vector<256x128xbf16>, vector<8x128xf32> -> vector<8x128xf32>
    %c0_3 = arith.constant 0 : index
    %c0_4 = arith.constant 0 : index
    %4 = vector.load %arg6[%c0_3, %c0_4] : memref<4x128xf32, #tpu.memory_space<vmem>>, vector<1x128xf32>
    %5 = vector.broadcast %4 : vector<1x128xf32> to vector<8x128xf32>
    %6 = arith.addf %3, %5 : vector<8x128xf32>
    %cst_5 = arith.constant 0.000000e+00 : f32
    %7 = vector.broadcast %cst_5 : f32 to vector<8x128xf32>
    %8 = arith.cmpf ogt, %6, %7 : vector<8x128xf32>
    %cst_6 = arith.constant 0.00999999977 : f32
    %9 = vector.broadcast %cst_6 : f32 to vector<8x128xf32>
    %10 = arith.mulf %9, %6 : vector<8x128xf32>
    %11 = arith.select %8, %6, %10 : vector<8x128xi1>, vector<8x128xf32>
    %12 = arith.truncf %11 : vector<8x128xf32> to vector<8x128xbf16>
    %c0_7 = arith.constant 0 : index
    %c0_8 = arith.constant 0 : index
    %13 = vector.load %arg3[%c0_7, %c0_8] : memref<128x128xbf16, #tpu.memory_space<vmem>>, vector<128x128xbf16>
    %cst_9 = arith.constant dense<0.000000e+00> : vector<8x128xf32>
    %14 = tpu.matmul %12, %13, %cst_9 {dimension_numbers = #tpu.dot_dimension_numbers<[1], [0], [0], [1], [0, 0, 1, 1], [], []>} : vector<8x128xbf16>, vector<128x128xbf16>, vector<8x128xf32> -> vector<8x128xf32>
    %c1 = arith.constant 1 : index
    %c0_10 = arith.constant 0 : index
    %15 = vector.load %arg6[%c1, %c0_10] : memref<4x128xf32, #tpu.memory_space<vmem>>, vector<1x128xf32>
    %16 = vector.broadcast %15 : vector<1x128xf32> to vector<8x128xf32>
    %17 = arith.addf %14, %16 : vector<8x128xf32>
    %cst_11 = arith.constant 0.000000e+00 : f32
    %18 = vector.broadcast %cst_11 : f32 to vector<8x128xf32>
    %19 = arith.cmpf ogt, %17, %18 : vector<8x128xf32>
    %cst_12 = arith.constant 0.00999999977 : f32
    %20 = vector.broadcast %cst_12 : f32 to vector<8x128xf32>
    %21 = arith.mulf %20, %17 : vector<8x128xf32>
    %22 = arith.select %19, %17, %21 : vector<8x128xi1>, vector<8x128xf32>
    %23 = arith.truncf %22 : vector<8x128xf32> to vector<8x128xbf16>
    %c0_13 = arith.constant 0 : index
    %c0_14 = arith.constant 0 : index
    %24 = vector.load %arg4[%c0_13, %c0_14] : memref<128x128xbf16, #tpu.memory_space<vmem>>, vector<128x128xbf16>
    %cst_15 = arith.constant dense<0.000000e+00> : vector<8x128xf32>
    %25 = tpu.matmul %23, %24, %cst_15 {dimension_numbers = #tpu.dot_dimension_numbers<[1], [0], [0], [1], [0, 0, 1, 1], [], []>} : vector<8x128xbf16>, vector<128x128xbf16>, vector<8x128xf32> -> vector<8x128xf32>
    %c2 = arith.constant 2 : index
    %c0_16 = arith.constant 0 : index
    %26 = vector.load %arg6[%c2, %c0_16] : memref<4x128xf32, #tpu.memory_space<vmem>>, vector<1x128xf32>
    %27 = vector.broadcast %26 : vector<1x128xf32> to vector<8x128xf32>
    %28 = arith.addf %25, %27 : vector<8x128xf32>
    %cst_17 = arith.constant 0.000000e+00 : f32
    %29 = vector.broadcast %cst_17 : f32 to vector<8x128xf32>
    %30 = arith.cmpf ogt, %28, %29 : vector<8x128xf32>
    %cst_18 = arith.constant 0.00999999977 : f32
    %31 = vector.broadcast %cst_18 : f32 to vector<8x128xf32>
    %32 = arith.mulf %31, %28 : vector<8x128xf32>
    %33 = arith.select %30, %28, %32 : vector<8x128xi1>, vector<8x128xf32>
    %c0_19 = arith.constant 0 : index
    %c0_20 = arith.constant 0 : index
    %34 = vector.load %arg5[%c0_19, %c0_20] : memref<1x128xf32, #tpu.memory_space<vmem>>, vector<1x128xf32>
    %35 = vector.broadcast %34 : vector<1x128xf32> to vector<8x128xf32>
    %36 = arith.mulf %33, %35 : vector<8x128xf32>
    %cst_21 = arith.constant dense<0.000000e+00> : vector<8xf32>
    %37 = vector.multi_reduction <add>, %36, %cst_21 [1] : vector<8x128xf32> to vector<8xf32>
    %38 = vector.shape_cast %37 : vector<8xf32> to vector<8x1xf32>
    %c3 = arith.constant 3 : index
    %c0_22 = arith.constant 0 : index
    %39 = vector.load %arg6[%c3, %c0_22] : memref<4x128xf32, #tpu.memory_space<vmem>>, vector<1x1xf32>
    %40 = vector.broadcast %39 : vector<1x1xf32> to vector<8x1xf32>
    %41 = arith.addf %38, %40 : vector<8x1xf32>
    %c0_23 = arith.constant 0 : index
    %c0_24 = arith.constant 0 : index
    %42 = vector.load %arg7[%c0_23, %c0_24] : memref<8x1xf32, #tpu.memory_space<vmem>>, vector<8x1xf32>
    tpu.vector_store %arg7[%c0_23, %c0_24], %41 {strides = array<i32>} : memref<8x1xf32, #tpu.memory_space<vmem>>, vector<8x1xf32>,
    return
  }
  func.func @transform_0(%arg0: i32) -> (i32, i32) {
    %c0_i32 = arith.constant 0 : i32
    %c0_i32_0 = arith.constant 0 : i32
    return %arg0, %c0_i32 : i32, i32
  }
  func.func @transform_1(%arg0: i32) -> (i32, i32) {
    %c0_i32 = arith.constant 0 : i32
    %c0_i32_0 = arith.constant 0 : i32
    %c0_i32_1 = arith.constant 0 : i32
    return %c0_i32, %c0_i32_0 : i32, i32
  }
  func.func @transform_2(%arg0: i32) -> (i32, i32) {
    %c0_i32 = arith.constant 0 : i32
    %c0_i32_0 = arith.constant 0 : i32
    %c0_i32_1 = arith.constant 0 : i32
    return %c0_i32, %c0_i32_0 : i32, i32
  }
  func.func @transform_3(%arg0: i32) -> (i32, i32) {
    %c0_i32 = arith.constant 0 : i32
    %c0_i32_0 = arith.constant 0 : i32
    %c0_i32_1 = arith.constant 0 : i32
    return %c0_i32, %c0_i32_0 : i32, i32
  }
  func.func @transform_4(%arg0: i32) -> (i32, i32) {
    %c0_i32 = arith.constant 0 : i32
    %c0_i32_0 = arith.constant 0 : i32
    %c0_i32_1 = arith.constant 0 : i32
    return %c0_i32, %c0_i32_0 : i32, i32
  }
  func.func @transform_5(%arg0: i32) -> (i32, i32) {
    %c0_i32 = arith.constant 0 : i32
    %c0_i32_0 = arith.constant 0 : i32
    %c0_i32_1 = arith.constant 0 : i32
    return %c0_i32, %c0_i32_0 : i32, i32
  }
  func.func @transform_6(%arg0: i32) -> (i32, i32) {
    %c0_i32 = arith.constant 0 : i32
    %c0_i32_0 = arith.constant 0 : i32
    return %arg0, %c0_i32 : i32, i32
  }
}

</mosaic_0001>

<bundles_post_ra>
// kernel: tpu_custom_call.1
= control target key start
LH: loop header
LB: loop body
LE: loop exit
PB: predicated region body
PF: predicated region fallthrough
CT: control target
= control target key end

     0   :  { %11 = vsyncpa [#allocation3], 0  ;;  %s895_s0 = inlined_call_operand.hbm [shape: f32[8,256], index: 0, kind: input, shape index: {}]   ;;  %s896_s1 = inlined_call_operand.hbm [shape: bf16[256,128], index: 1, kind: input, shape index: {}]   ;;  %s897_s2 = inlined_call_operand.hbm [shape: bf16[128,128], index: 2, kind: input, shape index: {}]   ;;  %s898_s3 = inlined_call_operand.hbm [shape: bf16[128,128], index: 3, kind: input, shape index: {}]   ;;  %s899_s4 = inlined_call_operand.vmem [shape: f32[1,128], index: 4, kind: input, shape index: {}]   ;;  %s900_s5 = inlined_call_operand.vmem [shape: f32[4,128], index: 5, kind: input, shape index: {}]   ;;  %s901_s6 = inlined_call_operand.vmem [shape: f32[8,1], index: 6, kind: output, shape index: {}]  }
   0x1   :  { %12 = vsyncpa [#allocation5], 0 }
   0x2   :  { %13 = vsyncpa [#allocation8], 0  ;;  %s759_s21 = smov [#allocation4]   ;;  %s665_s25 = scalar_lea.hbm %s896_s1, 2048 }
   0x3   :  { %s29_s22 = sshll.u32 %s759_s21, 4  ;;  %p666_p0 = scmp.ne.s32.totalorder %s896_s1, %s665_s25  ;;  %s30_s22 = int_to_ptr.vmem [resolvable:$true] %s29_s22 }
   0x4   :  { %p669_p1 = scmp.lt.u32.totalorder %s665_s25, %s896_s1 }
   0x6   :  { %p671_p2 = pnand %p669_p1, %p666_p0 }
   0x8   :  { %674 = shalt.err (!%p671_p2)
}
   0x9   :  { %s675_s30 = scalar_lea.vmem %s30_s22, 2048  ;;  %p680_p4 = scmp.lt.s32.totalorder %s30_s22, %s30_s22 }
   0xa   :  { %p676_p3 = scmp.ne.s32.totalorder %s30_s22, %s675_s30  ;;  %p681_p5 = scmp.lt.s32.totalorder %s675_s30, %s675_s30 }
   0xc   :  { %p682_p6 = por %p681_p5, %p680_p4 }
   0xe   :  { %p683_p7 = pnand %p682_p6, %p676_p3 }
  0x10   :  { %686 = shalt.err (!%p683_p7)
}
  0x11   :  { %s760_s7 = smov 64   ;;  %s761_s8 = smov 4  }
  0x12   :  { %35 = dma.hbm_to_vmem [thread:$0]  %s896_s1, 2048, %s30_s22, [#allocation5], %s760_s7, %s760_s7, %s761_s8  }
  0x13   :  { %s762_s11 = smov [#allocation2]   ;;  %s763_s13 = smov [#allocation6]  }
  0x14   :  { %s20_s12 = sshll.u32 %s762_s11, 4  ;;  %s41_s14 = sshll.u32 %s763_s13, 4  ;;  %s21_s12 = int_to_ptr.vmem [resolvable:$true] %s20_s12  ;;  %s42_s14 = int_to_ptr.vmem [resolvable:$true] %s41_s14 }
  0x15   :  { %s687_s17 = scalar_lea.hbm %s895_s0, 256 }
  0x16   :  { %p688_p8 = scmp.ne.s32.totalorder %s895_s0, %s687_s17  ;;  %p691_p9 = scmp.lt.u32.totalorder %s687_s17, %s895_s0 }
  0x18   :  { %p693_p10 = pnand %p691_p9, %p688_p8 }
  0x1a   :  { %696 = shalt.err (!%p693_p10)
}
  0x1b   :  { %s697_s1 = scalar_lea.vmem %s21_s12, 256  ;;  %p702_p12 = scmp.lt.s32.totalorder %s21_s12, %s21_s12 }
  0x1c   :  { %p698_p11 = scmp.ne.s32.totalorder %s21_s12, %s697_s1  ;;  %p703_p13 = scmp.lt.s32.totalorder %s697_s1, %s697_s1 }
  0x1e   :  { %p704_p0 = por %p703_p13, %p702_p12 }
  0x20   :  { %p705_p1 = pnand %p704_p0, %p698_p11 }
  0x22   :  { %708 = shalt.err (!%p705_p1)
}
  0x23   :  { %23 = dma.hbm_to_vmem [thread:$0]  %s895_s0, 256, %s21_s12, [#allocation3]  }
  0x24   :  { %s709_s26 = scalar_lea.hbm %s897_s2, 1024 }
  0x25   :  { %p710_p2 = scmp.ne.s32.totalorder %s897_s2, %s709_s26  ;;  %p713_p3 = scmp.lt.u32.totalorder %s709_s26, %s897_s2 }
  0x27   :  { %p715_p4 = pnand %p713_p3, %p710_p2 }
  0x29   :  { %718 = shalt.err (!%p715_p4)
}
  0x2a   :  { %s719_s9 = scalar_lea.vmem %s42_s14, 1024  ;;  %p724_p6 = scmp.lt.s32.totalorder %s42_s14, %s42_s14 }
  0x2b   :  { %p720_p5 = scmp.ne.s32.totalorder %s42_s14, %s719_s9  ;;  %p725_p7 = scmp.lt.s32.totalorder %s719_s9, %s719_s9 }
  0x2d   :  { %p726_p8 = por %p725_p7, %p724_p6 }
  0x2f   :  { %p727_p9 = pnand %p726_p8, %p720_p5 }
  0x31   :  { %730 = shalt.err (!%p727_p9)
}
  0x32   :  { %47 = dma.hbm_to_vmem [thread:$0]  %s897_s2, 1024, %s42_s14, [#allocation5], %s760_s7, %s760_s7, %s761_s8  }
  0x33   :  { %s764_s11 = smov [#allocation7]   ;;  %s731_s16 = scalar_lea.hbm %s898_s3, 1024 }
  0x34   :  { %s53_s12 = sshll.u32 %s764_s11, 4  ;;  %p732_p10 = scmp.ne.s32.totalorder %s898_s3, %s731_s16  ;;  %s54_s12 = int_to_ptr.vmem [resolvable:$true] %s53_s12 }
  0x35   :  { %p735_p11 = scmp.lt.u32.totalorder %s731_s16, %s898_s3 }
  0x37   :  { %p737_p12 = pnand %p735_p11, %p732_p10 }
  0x39   :  { %740 = shalt.err (!%p737_p12)
}
  0x3a   :  { %s741_s21 = scalar_lea.vmem %s54_s12, 1024  ;;  %p746_p0 = scmp.lt.s32.totalorder %s54_s12, %s54_s12 }
  0x3b   :  { %p742_p13 = scmp.ne.s32.totalorder %s54_s12, %s741_s21  ;;  %p747_p1 = scmp.lt.s32.totalorder %s741_s21, %s741_s21 }
  0x3d   :  { %p748_p2 = por %p747_p1, %p746_p0 }
  0x3f   :  { %p749_p3 = pnand %p748_p2, %p742_p13 }
  0x41   :  { %752 = shalt.err (!%p749_p3)
}
  0x42   :  { %59 = dma.hbm_to_vmem [thread:$0]  %s898_s3, 1024, %s54_s12, [#allocation8], %s760_s7, %s760_s7, %s761_s8  }
  0x43   :  { %753 = dma.done.wait [#allocation3], 256  }
  0x44   :  { %754 = vsyncadd [#allocation3], 4294967040 }
  0x45   :  { %755 = dma.done.wait [#allocation5], 3072  }
  0x46   :  { %756 = vsyncadd [#allocation5], 4294964224 }
  0x47   :  { %757 = dma.done.wait [#allocation8], 1024  }
  0x48   :  { %758 = vsyncadd [#allocation8], 4294966272  ;;  %v765_v0 = vmov 0.0   ;;  %v633_v1 = vld [vmem:[#allocation4 + $0x40] sm:$0xff]   ;;  %v635_v3 = vld [vmem:[#allocation4 + $0x48] sm:$0xff]   ;;  %vm766_vm0 = vmmov 0  }
  0x49   :  { %585 = vmatprep.subr.bf16.mxu1 %v765_v0  ;;  %v634_v2 = vld [vmem:[#allocation4] sm:$0xff]   ;;  %545 = vmatprep.subr.bf16.mxu0 %v633_v1  ;;  %v636_v4 = vld [vmem:[#allocation4 + $0x8] sm:$0xff]   ;;  %v637_v5 = vld [vmem:[#allocation4 + $0x50] sm:$0xff]   ;;  %vm499_vm4 = vcmask 7168  }
  0x4a   :  { %546 = vmatpush3.bf16.msra.mxu0 %v634_v2  ;;  %v638_v6 = vld [vmem:[#allocation4 + $0x10] sm:$0xff]   ;;  %v639_v7 = vld [vmem:[#allocation4 + $0x58] sm:$0xff]   ;;  %v641_v9 = vld [vmem:[#allocation4 + $0x60] sm:$0xff]   ;;  %601 = vmatprep.mubr.msk.bf16.mxu1 %vm766_vm0, %v765_v0 }
  0x4b   :  { %547 = vmatprep.subr.bf16.mxu0 %v635_v3  ;;  %v640_v8 = vld [vmem:[#allocation4 + $0x18] sm:$0xff]   ;;  %v642_v10 = vld [vmem:[#allocation4 + $0x20] sm:$0xff]   ;;  %v643_v11 = vld [vmem:[#allocation4 + $0x68] sm:$0xff]  }
  0x4c   :  { %v78_v12 = vld [vmem:[#allocation2 + $0x8] sm:$0xff]  ;;  %v649_v14 = vld [vmem:[#allocation6] sm:$0xff]   ;;  %v644_v15 = vld [vmem:[#allocation4 + $0x28] sm:$0xff]  }
  0x4d   :  { %v80_v13 = vpack.c.bf16 %v78_v12, %v78_v12  ;;  %v645_v16 = vld [vmem:[#allocation4 + $0x70] sm:$0xff]   ;;  %586 = vmatpush3.bf16.msra.mxu1 %v649_v14  ;;  %v650_v17 = vld [vmem:[#allocation6 + $0x8] sm:$0xff]   ;;  %v647_v19 = vld [vmem:[#allocation4 + $0x78] sm:$0xff]  }
  0x4e   :  { %548 = vmatpush3.bf16.msra.mxu0 %v636_v4  ;;  %v646_v18 = vld [vmem:[#allocation4 + $0x30] sm:$0xff]   ;;  %587 = vmatprep.subr.bf16.mxu1 %v765_v0  ;;  %v648_v21 = vld [vmem:[#allocation4 + $0x38] sm:$0xff]   ;;  %v653_v25 = vld [vmem:[#allocation6 + $0x20] sm:$0xff]  }
  0x4f   :  { %549 = vmatprep.subr.bf16.mxu0 %v637_v5  ;;  %246 = vmatprep.mubr.bf16.mxu0 %v80_v13  ;;  %v651_v20 = vld [vmem:[#allocation6 + $0x10] sm:$0xff]   ;;  %v652_v23 = vld [vmem:[#allocation6 + $0x18] sm:$0xff]   ;;  %v654_v26 = vld [vmem:[#allocation6 + $0x28] sm:$0xff]  }
  0x50   :  { %v77_v22 = vld [vmem:[#allocation2] sm:$0xff]  ;;  %v656_v28 = vld [vmem:[#allocation6 + $0x38] sm:$0xff]   ;;  %v657_v29 = vld [vmem:[#allocation7] sm:$0xff]  }
  0x51   :  { %588 = vmatpush3.bf16.msra.mxu1 %v650_v17  ;;  %v79_v24 = vpack.c.bf16 %v77_v22, %v77_v22  ;;  %v655_v27 = vld [vmem:[#allocation6 + $0x30] sm:$0xff]   ;;  %v658_v30 = vld [vmem:[#allocation7 + $0x8] sm:$0xff]   ;;  %v660_v32 = vld [vmem:[#allocation7 + $0x18] sm:$0xff]  }
  0x52   :  { %550 = vmatpush3.bf16.msra.mxu0 %v638_v6  ;;  %589 = vmatprep.subr.bf16.mxu1 %v765_v0  ;;  %v659_v31 = vld [vmem:[#allocation7 + $0x10] sm:$0xff]   ;;  %v661_v33 = vld [vmem:[#allocation7 + $0x20] sm:$0xff]   ;;  %v662_v34 = vld [vmem:[#allocation7 + $0x28] sm:$0xff]  }
  0x53   :  { %551 = vmatprep.subr.bf16.mxu0 %v639_v7  ;;  %v508_v36 = vld [vmem:[%s900_s5] ss:$0 sm:$0xff]  ;;  %v664_v46 = vld [vmem:[#allocation7 + $0x38] sm:$0xff]   ;;  %v525_v47 = vld [vmem:[%s900_s5 + $0x1] ss:$0 sm:$0xff] }
  0x54   :  { %v663_v45 = vld [vmem:[#allocation7 + $0x30] sm:$0xff]  }
  0x55   :  { %590 = vmatpush3.bf16.msra.mxu1 %v651_v20  ;;  %v534_v56 = vld [vmem:[%s900_s5 + $0x2] ss:$0 sm:$0xff]  ;;  %v543_v63 = vld [vmem:[%s899_s4] ss:$0 sm:$0xff]  ;;  %v544_v2 = vld [vmem:[%s900_s5 + $0x3] ss:$0 sm:$0xff] }
  0x56   :  { %552 = vmatpush3.bf16.msra.mxu0 %v640_v8  ;;  %591 = vmatprep.subr.bf16.mxu1 %v765_v0 }
  0x57   :  { %553 = vmatprep.subr.bf16.mxu0 %v641_v9 }
  0x59   :  { %592 = vmatpush3.bf16.msra.mxu1 %v652_v23 }
  0x5a   :  { %554 = vmatpush3.bf16.msra.mxu0 %v642_v10  ;;  %593 = vmatprep.subr.bf16.mxu1 %v765_v0 }
  0x5b   :  { %555 = vmatprep.subr.bf16.mxu0 %v643_v11 }
  0x5d   :  { %594 = vmatpush3.bf16.msra.mxu1 %v653_v25 }
  0x5e   :  { %556 = vmatpush3.bf16.msra.mxu0 %v644_v15  ;;  %595 = vmatprep.subr.bf16.mxu1 %v765_v0 }
  0x5f   :  { %557 = vmatprep.subr.bf16.mxu0 %v645_v16 }
  0x61   :  { %596 = vmatpush3.bf16.msra.mxu1 %v654_v26 }
  0x62   :  { %558 = vmatpush3.bf16.msra.mxu0 %v646_v18  ;;  %597 = vmatprep.subr.bf16.mxu1 %v765_v0 }
  0x63   :  { %559 = vmatprep.subr.bf16.mxu0 %v647_v19 }
  0x65   :  { %598 = vmatpush3.bf16.msra.mxu1 %v655_v27 }
  0x66   :  { %560 = vmatpush3.bf16.msra.mxu0 %v648_v21  ;;  %599 = vmatprep.subr.bf16.mxu1 %v765_v0 }
  0x67   :  { %605 = vmatprep.subr.bf16.mxu0 %v765_v0 }
  0x69   :  { %247 = vmatmul.mubr.bf16.vlgmr.msra.gmra.mrb[0].mxu0 %v79_v24  ;;  %600 = vmatpush3.bf16.msra.mxu1 %v656_v28 }
  0x6a   :  { %621 = vmatprep.mubr.msk.bf16.mxu0 %vm766_vm0, %v765_v0  ;;  %606 = vmatpush3.bf16.msra.mxu0 %v657_v29 }
  0x6b   :  { %607 = vmatprep.subr.bf16.mxu0 %v765_v0 }
  0x6e   :  { %608 = vmatpush3.bf16.msra.mxu0 %v658_v30 }
  0x6f   :  { %609 = vmatprep.subr.bf16.mxu0 %v765_v0 }
  0x72   :  { %610 = vmatpush3.bf16.msra.mxu0 %v659_v31 }
  0x73   :  { %611 = vmatprep.subr.bf16.mxu0 %v765_v0 }
  0x76   :  { %612 = vmatpush3.bf16.msra.mxu0 %v660_v32 }
  0x77   :  { %613 = vmatprep.subr.bf16.mxu0 %v765_v0 }
  0x7a   :  { %614 = vmatpush3.bf16.msra.mxu0 %v661_v33 }
  0x7b   :  { %615 = vmatprep.subr.bf16.mxu0 %v765_v0 }
  0x7e   :  { %616 = vmatpush3.bf16.msra.mxu0 %v662_v34 }
  0x7f   :  { %617 = vmatprep.subr.bf16.mxu0 %v765_v0 }
  0x82   :  { %618 = vmatpush3.bf16.msra.mxu0 %v663_v45 }
  0x83   :  { %619 = vmatprep.subr.bf16.mxu0 %v765_v0 }
  0x86   :  { %620 = vmatpush3.bf16.msra.mxu0 %v664_v46 }
 0x13c   :  { %v561_v35 = vpop.f32.mrb[0].mxu0 }
 0x13d   :  { %v562_v37 = vpop.f32.mrb[1].mxu0 }
 0x13e   :  { %v563_v38 = vadd.f32 %v562_v37, %v561_v35  ;;  %v564_v39 = vpop.f32.mrb[2].mxu0 }
 0x13f   :  { %v565_v40 = vpop.f32.mrb[3].mxu0 }
 0x140   :  { %v249_v41 = vadd.f32 %v563_v38, %v508_v36 }
 0x142   :  { %v255_v42 = vmul.f32 0.01, %v249_v41  ;;  %vm254_vm1 = vcmp.gt.f32.partialorder %v249_v41, 0.0 }
 0x144   :  { %v256_v43 = vsel %vm254_vm1, %v249_v41, %v255_v42 }
 0x145   :  { %v257_v44 = vpack.c.bf16 %v256_v43, %v256_v43 }
 0x147   :  { %602 = vmatmul.mubr.bf16.vlgmr.msra.gmra.mrb[0].mxu1 %v257_v44 }
 0x21a   :  { %v361_v48 = vpop.f32.mrb[0].mxu1 }
 0x21b   :  { %v362_v49 = vadd.f32 %v525_v47, %v361_v48  ;;  %v603_v50 = vpop.f32.mrb[1].mxu1 }
 0x21c   :  { %v364_v51 = vpop.f32.mrb[2].mxu1 }
 0x21d   :  { %vm367_vm2 = vcmp.gt.f32.partialorder %v362_v49, 0.0  ;;  %v368_v52 = vmul.f32 0.01, %v362_v49  ;;  %v604_v53 = vpop.f32.mrb[3].mxu1 }
 0x21f   :  { %v369_v54 = vsel %vm367_vm2, %v362_v49, %v368_v52 }
 0x220   :  { %v370_v55 = vpack.c.bf16 %v369_v54, %v369_v54 }
 0x222   :  { %622 = vmatmul.mubr.bf16.vlgmr.msra.gmra.mrb[4].mxu0 %v370_v55 }
 0x2f5   :  { %v474_v57 = vpop.f32.mrb[4].mxu0 }
 0x2f6   :  { %v475_v58 = vadd.f32 %v534_v56, %v474_v57  ;;  %v623_v59 = vpop.f32.mrb[5].mxu0 }
 0x2f7   :  { %v477_v60 = vpop.f32.mrb[6].mxu0 }
 0x2f8   :  { %v481_v61 = vmul.f32 0.01, %v475_v58  ;;  %v624_v62 = vpop.f32.mrb[7].mxu0  ;;  %vm480_vm3 = vcmp.gt.f32.partialorder %v475_v58, 0.0 }
 0x2fa   :  { %v482_v0 = vsel %vm480_vm3, %v475_v58, %v481_v61 }
 0x2fb   :  { %v490_v1 = vmul.f32 %v543_v63, %v482_v0 }
 0x2fd   :  { %491 = vadd.xlane.f32.xlu0 %v490_v1 }
 0x38a   :  { %v492_v3 = vpop.xlane.xlu0 %491 }
 0x38b   :  { %v498_v4 = vadd.f32 %v544_v2, %v492_v3 }
 0x38d   :  { %500 = vst.msk [vmem:[%s901_s6] sm:$0xff] %vm499_vm4, %v498_v4 }
 0x38e   :  { %505 = vsyncpa [#allocation3], 1 }
 0x38f   :  { %506 = vsyncpa [#allocation5], 1 }
 0x390   :  { %507 = vsyncpa [#allocation8], 1 }

</bundles_post_ra>
